<compile_context>
chip_gen: v5e
topology: v5e:2x2
jax: 0.10.0
libtpu: 0.0.40
codegen_flags: <defaults>
</compile_context>

<pallas_src>
import jax
import jax.numpy as jnp
from jax import lax
from jax.experimental import pallas as pl
from jax.experimental.pallas import tpu as pltpu

EPS = 1e-5
LANE = 128
NEG = -1e30  # bias for padded logit columns -> exp() underflows to exactly 0


def _encoder_kernel(x_ref,
                    w1_ref, g1_ref, be1_ref,
                    w2_ref, g2_ref, be2_ref,
                    w3_ref, b3_ref,
                    o_ref,
                    h1_s, h2_s, bn1_s, bn2_s):
    p = pl.program_id(0)          # phase
    t = pl.program_id(1)          # batch tile
    bt = x_ref.shape[0]
    n_rows = h1_s.shape[0]        # full batch = BN statistics population
    inv_b = 1.0 / n_rows
    row = pl.ds(pl.multiple_of(t * bt, bt), bt)

    def bn_scale_shift(h_all, g, be):
        # two-pass (centered) biased variance, all in f32
        mu = jnp.sum(h_all, axis=0, keepdims=True) * inv_b
        d = h_all - mu
        var = jnp.sum(d * d, axis=0, keepdims=True) * inv_b
        scale = g * lax.rsqrt(var + EPS)          # 1 x D row math
        shift = be - mu * scale
        return scale, shift

    # ---- phase 0: h1 = x @ W1 (pre-BN bias dropped), stash whole batch ----
    @pl.when(p == 0)
    def _():
        h1 = jnp.dot(x_ref[...].astype(jnp.bfloat16), w1_ref[...],
                     preferred_element_type=jnp.float32)
        h1_s[row, :] = h1
        # output block is written back every step; keep it deterministic
        # (overwritten with real data in phase 2; negligible at these widths)
        o_ref[...] = jnp.zeros_like(o_ref)

    # ---- phase 1: BN1 (full-batch stats) -> ReLU -> h2 = a1 @ W2, stash ----
    @pl.when(p == 1)
    def _():
        @pl.when(t == 0)
        def _():
            scale, shift = bn_scale_shift(h1_s[...], g1_ref[...], be1_ref[...])
            bn1_s[0:1, :] = scale
            bn1_s[1:2, :] = shift
        a1 = jnp.maximum(h1_s[row, :] * bn1_s[0:1, :] + bn1_s[1:2, :], 0.0)
        h2 = jnp.dot(a1.astype(jnp.bfloat16), w2_ref[...],
                     preferred_element_type=jnp.float32)
        h2_s[row, :] = h2
        o_ref[...] = jnp.zeros_like(o_ref)

    # ---- phase 2: BN2 -> ReLU -> logits = a2 @ W3 + b3 -> softmax ----
    @pl.when(p == 2)
    def _():
        @pl.when(t == 0)
        def _():
            scale, shift = bn_scale_shift(h2_s[...], g2_ref[...], be2_ref[...])
            bn2_s[0:1, :] = scale
            bn2_s[1:2, :] = shift
        a2 = jnp.maximum(h2_s[row, :] * bn2_s[0:1, :] + bn2_s[1:2, :], 0.0)
        logits = jnp.dot(a2.astype(jnp.bfloat16), w3_ref[...],
                         preferred_element_type=jnp.float32) + b3_ref[...]
        logits = logits - jnp.max(logits, axis=1, keepdims=True)
        e = jnp.exp(logits)                      # padded cols -> exp(-1e30) = 0
        o_ref[...] = e / jnp.sum(e, axis=1, keepdims=True)   # exact normalization


def _ceil_to(n, m):
    return ((n + m - 1) // m) * m


def prepare_params(params, input_dim, embedding_dim):
    """One-time prep: transpose PyTorch (out,in) weights to (in,out), cast to
    bf16 (halves weight DMA; MXU is bf16-native), drop the redundant pre-BN
    biases, keep hidden widths natural (no zero padding DMA'd), and lane-pad
    only the final layer to 128 (zero weight columns, -1e30 bias)."""
    del input_dim
    d3 = embedding_dim[-1]
    d3p = _ceil_to(d3, LANE)
    w1 = params["w1"].T.astype(jnp.bfloat16)                        # (d0, d1)
    w2 = params["w2"].T.astype(jnp.bfloat16)                        # (d1, d2)
    w3 = jnp.pad(params["w3"].T, ((0, 0), (0, d3p - d3))).astype(jnp.bfloat16)
    g1 = params["g1"][None, :].astype(jnp.float32)
    be1 = params["be1"][None, :].astype(jnp.float32)
    g2 = params["g2"][None, :].astype(jnp.float32)
    be2 = params["be2"][None, :].astype(jnp.float32)
    b3 = jnp.pad(params["b3"][None, :].astype(jnp.float32),
                 ((0, 0), (0, d3p - d3)), constant_values=NEG)
    return (w1, g1, be1, w2, g2, be2, w3, b3)


def encoder_forward(x, prep, *, batch_tile=8):
    """x: (B, input_dim) f32.  Returns the 128-lane-padded probability slab
    (B, ceil(out_dim/128)*128).  Real probabilities are columns [:out_dim];
    padded columns are exactly 0.  Slicing is deferred to the consumer."""
    B, d0 = x.shape
    w1, g1, be1, w2, g2, be2, w3, b3 = prep
    d1, d2, d3p = w1.shape[1], w2.shape[1], w3.shape[1]
    assert B % batch_tile == 0
    nt = B // batch_tile

    def resident(a):  # same block every grid step -> stays VMEM-resident
        return pl.BlockSpec(a.shape, lambda p, t: (0, 0))

    grid_spec = pltpu.PrefetchScalarGridSpec(
        num_scalar_prefetch=0,
        grid=(3, nt),                                   # (phase, batch tile)
        in_specs=[
            pl.BlockSpec((batch_tile, d0), lambda p, t: (t, 0)),   # x tile
            resident(w1), resident(g1), resident(be1),
            resident(w2), resident(g2), resident(be2),
            resident(w3), resident(b3),
        ],
        out_specs=pl.BlockSpec((batch_tile, d3p), lambda p, t: (t, 0)),
        scratch_shapes=[
            pltpu.VMEM((B, d1), jnp.float32),     # h1 stash (whole batch)
            pltpu.VMEM((B, d2), jnp.float32),     # h2 stash (whole batch)
            pltpu.VMEM((2, d1), jnp.float32),     # BN1 [scale; shift]
            pltpu.VMEM((2, d2), jnp.float32),     # BN2 [scale; shift]
        ],
    )
    return pl.pallas_call(
        _encoder_kernel,
        out_shape=jax.ShapeDtypeStruct((B, d3p), jnp.float32),
        grid_spec=grid_spec,
        compiler_params=pltpu.CompilerParams(
            dimension_semantics=("arbitrary", "arbitrary")),
    )(x, *prep)


def init_params(key, input_dim, embedding_dim):
    """PyTorch-layout init: nn.Linear uniform(+/-1/sqrt(fan_in)) weights (out,in)
    and biases; BatchNorm1d gamma=1, beta=0."""
    dims = [input_dim] + list(embedding_dim)
    params = {}
    for i in range(len(dims) - 1):
        fan_in, fan_out = dims[i], dims[i + 1]
        key, kw, kb = jax.random.split(key, 3)
        bound = 1.0 / jnp.sqrt(fan_in)
        params[f"w{i+1}"] = jax.random.uniform(
            kw, (fan_out, fan_in), jnp.float32, -bound, bound)
        params[f"b{i+1}"] = jax.random.uniform(
            kb, (fan_out,), jnp.float32, -bound, bound)
        if i < len(dims) - 2:  # BN only on non-final layers
            params[f"g{i+1}"] = jnp.ones((fan_out,), jnp.float32)
            params[f"be{i+1}"] = jnp.zeros((fan_out,), jnp.float32)
    return params


def _reference(x, params):
    """Pure-JAX f32 reference of the PyTorch train-mode forward (with biases)."""
    h = x @ params["w1"].T + params["b1"]
    mu, var = h.mean(0), h.var(0)
    h = jnp.maximum((h - mu) / jnp.sqrt(var + EPS) * params["g1"] + params["be1"], 0.0)
    h = h @ params["w2"].T + params["b2"]
    mu, var = h.mean(0), h.var(0)
    h = jnp.maximum((h - mu) / jnp.sqrt(var + EPS) * params["g2"] + params["be2"], 0.0)
    h = h @ params["w3"].T + params["b3"]
    return jax.nn.softmax(h, axis=1)


if __name__ == "__main__":
    key = jax.random.PRNGKey(0)
    input_dim = 32
    embedding_dim = [64, 32, 16]
    batch = 32            # small, but enough tiles (4) to exercise the grid

    kx, kp = jax.random.split(key)
    x = jax.random.normal(kx, (batch, input_dim), jnp.float32)
    params = init_params(kp, input_dim, embedding_dim)
    prep = prepare_params(params, input_dim, embedding_dim)  # one-time cost

    out_padded = encoder_forward(x, prep, batch_tile=8)
    out_padded = jax.block_until_ready(out_padded)
    out = out_padded[:, :embedding_dim[-1]]   # slice deferred to the consumer (the test)

    ref = _reference(x, params)
    assert out.shape == (batch, embedding_dim[-1])
    # slack accounts for bf16 matmul operands (accumulation & BN math are f32)
    assert jnp.allclose(out, ref, atol=2e-2, rtol=1e-1), float(jnp.max(jnp.abs(out - ref)))
    # normalization is exact now (no approx reciprocal)
    assert jnp.allclose(out.sum(axis=1), 1.0, atol=1e-4)
    # padded logit columns must carry exactly zero probability
    assert jnp.allclose(out_padded[:, embedding_dim[-1]:], 0.0)

    print("KERNEL_OK")
</pallas_src>

<mosaic_0001>
module attributes {stable_mosaic.version = 11 : i64} {
  func.func @_encoder_kernel(%arg0: i32, %arg1: i32, %arg2: memref<8x32xf32, #tpu.memory_space<vmem>>, %arg3: memref<32x64xbf16, #tpu.memory_space<vmem>>, %arg4: memref<1x64xf32, #tpu.memory_space<vmem>>, %arg5: memref<1x64xf32, #tpu.memory_space<vmem>>, %arg6: memref<64x32xbf16, #tpu.memory_space<vmem>>, %arg7: memref<1x32xf32, #tpu.memory_space<vmem>>, %arg8: memref<1x32xf32, #tpu.memory_space<vmem>>, %arg9: memref<32x128xbf16, #tpu.memory_space<vmem>>, %arg10: memref<1x128xf32, #tpu.memory_space<vmem>>, %arg11: memref<8x128xf32, #tpu.memory_space<vmem>>, %arg12: memref<32x64xf32, #tpu.memory_space<vmem>>, %arg13: memref<32x32xf32, #tpu.memory_space<vmem>>, %arg14: memref<2x64xf32, #tpu.memory_space<vmem>>, %arg15: memref<2x32xf32, #tpu.memory_space<vmem>>) attributes {dimension_semantics = [#tpu.dimension_semantics<arbitrary>, #tpu.dimension_semantics<arbitrary>], iteration_bounds = array<i64: 3, 4>, scalar_prefetch = 0 : i64, scratch_operands = 4 : i64, tpu.core_type = #tpu.core_type<tc>, window_params = [{transform_indices = @transform_0, window_bounds = array<i64: 8, 32>}, {pipeline_mode = #tpu.pipeline_mode<synchronous>, transform_indices = @transform_1, window_bounds = array<i64: 32, 64>}, {pipeline_mode = #tpu.pipeline_mode<synchronous>, transform_indices = @transform_2, window_bounds = array<i64: 1, 64>}, {pipeline_mode = #tpu.pipeline_mode<synchronous>, transform_indices = @transform_3, window_bounds = array<i64: 1, 64>}, {pipeline_mode = #tpu.pipeline_mode<synchronous>, transform_indices = @transform_4, window_bounds = array<i64: 64, 32>}, {pipeline_mode = #tpu.pipeline_mode<synchronous>, transform_indices = @transform_5, window_bounds = array<i64: 1, 32>}, {pipeline_mode = #tpu.pipeline_mode<synchronous>, transform_indices = @transform_6, window_bounds = array<i64: 1, 32>}, {pipeline_mode = #tpu.pipeline_mode<synchronous>, transform_indices = @transform_7, window_bounds = array<i64: 32, 128>}, {pipeline_mode = #tpu.pipeline_mode<synchronous>, transform_indices = @transform_8, window_bounds = array<i64: 1, 128>}, {transform_indices = @transform_9, window_bounds = array<i64: 8, 128>}]} {
    %c8_i32 = arith.constant 8 : i32
    %0 = arith.muli %arg1, %c8_i32 : i32
    %1 = tpu.assume_multiple %0, 8 : i32
    %c0_i32 = arith.constant 0 : i32
    %2 = arith.cmpi eq, %arg0, %c0_i32 : i32
    %3 = arith.extui %2 : i1 to i32
    %c0_i32_0 = arith.constant 0 : i32
    %4 = arith.cmpi ne, %3, %c0_i32_0 : i32
    scf.if %4 {
      %c0 = arith.constant 0 : index
      %c0_3 = arith.constant 0 : index
      %11 = vector.load %arg2[%c0, %c0_3] : memref<8x32xf32, #tpu.memory_space<vmem>>, vector<8x32xf32>
      %12 = arith.truncf %11 : vector<8x32xf32> to vector<8x32xbf16>
      %c0_4 = arith.constant 0 : index
      %c0_5 = arith.constant 0 : index
      %13 = vector.load %arg3[%c0_4, %c0_5] : memref<32x64xbf16, #tpu.memory_space<vmem>>, vector<32x64xbf16>
      %cst = arith.constant dense<0.000000e+00> : vector<8x64xf32>
      %14 = tpu.matmul %12, %13, %cst {dimension_numbers = #tpu.dot_dimension_numbers<[1], [0], [0], [1], [0, 0, 1, 1], [], []>} : vector<8x32xbf16>, vector<32x64xbf16>, vector<8x64xf32> -> vector<8x64xf32>
      %15 = arith.index_cast %1 : i32 to index
      %c0_6 = arith.constant 0 : index
      %16 = vector.load %arg12[%15, %c0_6] : memref<32x64xf32, #tpu.memory_space<vmem>>, vector<8x64xf32>
      tpu.vector_store %arg12[%15, %c0_6], %14 {strides = array<i32>} : memref<32x64xf32, #tpu.memory_space<vmem>>, vector<8x64xf32>,
      %cst_7 = arith.constant 0.000000e+00 : f32
      %17 = vector.broadcast %cst_7 : f32 to vector<8x128xf32>
      %c0_8 = arith.constant 0 : index
      %c0_9 = arith.constant 0 : index
      %18 = vector.load %arg11[%c0_8, %c0_9] : memref<8x128xf32, #tpu.memory_space<vmem>>, vector<8x128xf32>
      tpu.vector_store %arg11[%c0_8, %c0_9], %17 {strides = array<i32>} : memref<8x128xf32, #tpu.memory_space<vmem>>, vector<8x128xf32>,
    } else {
    }
    %c1_i32 = arith.constant 1 : i32
    %5 = arith.cmpi eq, %arg0, %c1_i32 : i32
    %6 = arith.extui %5 : i1 to i32
    %c0_i32_1 = arith.constant 0 : i32
    %7 = arith.cmpi ne, %6, %c0_i32_1 : i32
    scf.if %7 {
      %c0_i32_3 = arith.constant 0 : i32
      %11 = arith.cmpi eq, %arg1, %c0_i32_3 : i32
      %12 = arith.extui %11 : i1 to i32
      %c0_i32_4 = arith.constant 0 : i32
      %13 = arith.cmpi ne, %12, %c0_i32_4 : i32
      scf.if %13 {
        %c0_15 = arith.constant 0 : index
        %c0_16 = arith.constant 0 : index
        %31 = vector.load %arg12[%c0_15, %c0_16] : memref<32x64xf32, #tpu.memory_space<vmem>>, vector<32x64xf32>
        %c0_17 = arith.constant 0 : index
        %c0_18 = arith.constant 0 : index
        %32 = vector.load %arg4[%c0_17, %c0_18] : memref<1x64xf32, #tpu.memory_space<vmem>>, vector<1x64xf32>
        %c0_19 = arith.constant 0 : index
        %c0_20 = arith.constant 0 : index
        %33 = vector.load %arg5[%c0_19, %c0_20] : memref<1x64xf32, #tpu.memory_space<vmem>>, vector<1x64xf32>
        %cst_21 = arith.constant dense<0.000000e+00> : vector<64xf32>
        %34 = vector.multi_reduction <add>, %31, %cst_21 [0] : vector<32x64xf32> to vector<64xf32>
        %35 = vector.shape_cast %34 : vector<64xf32> to vector<1x64xf32>
        %cst_22 = arith.constant 3.125000e-02 : f32
        %36 = vector.broadcast %cst_22 : f32 to vector<1x64xf32>
        %37 = arith.mulf %35, %36 : vector<1x64xf32>
        %38 = vector.broadcast %37 : vector<1x64xf32> to vector<32x64xf32>
        %39 = arith.subf %31, %38 : vector<32x64xf32>
        %40 = arith.mulf %39, %39 : vector<32x64xf32>
        %cst_23 = arith.constant dense<0.000000e+00> : vector<64xf32>
        %41 = vector.multi_reduction <add>, %40, %cst_23 [0] : vector<32x64xf32> to vector<64xf32>
        %42 = vector.shape_cast %41 : vector<64xf32> to vector<1x64xf32>
        %cst_24 = arith.constant 3.125000e-02 : f32
        %43 = vector.broadcast %cst_24 : f32 to vector<1x64xf32>
        %44 = arith.mulf %42, %43 : vector<1x64xf32>
        %cst_25 = arith.constant 9.99999974E-6 : f32
        %45 = vector.broadcast %cst_25 : f32 to vector<1x64xf32>
        %46 = arith.addf %44, %45 : vector<1x64xf32>
        %47 = math.rsqrt %46 : vector<1x64xf32>
        %48 = arith.mulf %32, %47 : vector<1x64xf32>
        %49 = arith.mulf %37, %48 : vector<1x64xf32>
        %50 = arith.subf %33, %49 : vector<1x64xf32>
        %c0_26 = arith.constant 0 : index
        %c0_27 = arith.constant 0 : index
        %51 = vector.load %arg14[%c0_26, %c0_27] : memref<2x64xf32, #tpu.memory_space<vmem>>, vector<1x64xf32>
        tpu.vector_store %arg14[%c0_26, %c0_27], %48 {strides = array<i32>} : memref<2x64xf32, #tpu.memory_space<vmem>>, vector<1x64xf32>,
        %c1_28 = arith.constant 1 : index
        %c0_29 = arith.constant 0 : index
        %52 = vector.load %arg14[%c1_28, %c0_29] : memref<2x64xf32, #tpu.memory_space<vmem>>, vector<1x64xf32>
        tpu.vector_store %arg14[%c1_28, %c0_29], %50 {strides = array<i32>} : memref<2x64xf32, #tpu.memory_space<vmem>>, vector<1x64xf32>,
      } else {
      }
      %14 = arith.index_cast %1 : i32 to index
      %c0 = arith.constant 0 : index
      %15 = vector.load %arg12[%14, %c0] : memref<32x64xf32, #tpu.memory_space<vmem>>, vector<8x64xf32>
      %c0_5 = arith.constant 0 : index
      %c0_6 = arith.constant 0 : index
      %16 = vector.load %arg14[%c0_5, %c0_6] : memref<2x64xf32, #tpu.memory_space<vmem>>, vector<1x64xf32>
      %17 = vector.broadcast %16 : vector<1x64xf32> to vector<8x64xf32>
      %18 = arith.mulf %15, %17 : vector<8x64xf32>
      %c1 = arith.constant 1 : index
      %c0_7 = arith.constant 0 : index
      %19 = vector.load %arg14[%c1, %c0_7] : memref<2x64xf32, #tpu.memory_space<vmem>>, vector<1x64xf32>
      %20 = vector.broadcast %19 : vector<1x64xf32> to vector<8x64xf32>
      %21 = arith.addf %18, %20 : vector<8x64xf32>
      %cst = arith.constant 0.000000e+00 : f32
      %22 = vector.broadcast %cst : f32 to vector<8x64xf32>
      %23 = arith.maximumf %21, %22 : vector<8x64xf32>
      %24 = arith.truncf %23 : vector<8x64xf32> to vector<8x64xbf16>
      %c0_8 = arith.constant 0 : index
      %c0_9 = arith.constant 0 : index
      %25 = vector.load %arg6[%c0_8, %c0_9] : memref<64x32xbf16, #tpu.memory_space<vmem>>, vector<64x32xbf16>
      %cst_10 = arith.constant dense<0.000000e+00> : vector<8x32xf32>
      %26 = tpu.matmul %24, %25, %cst_10 {dimension_numbers = #tpu.dot_dimension_numbers<[1], [0], [0], [1], [0, 0, 1, 1], [], []>} : vector<8x64xbf16>, vector<64x32xbf16>, vector<8x32xf32> -> vector<8x32xf32>
      %27 = arith.index_cast %1 : i32 to index
      %c0_11 = arith.constant 0 : index
      %28 = vector.load %arg13[%27, %c0_11] : memref<32x32xf32, #tpu.memory_space<vmem>>, vector<8x32xf32>
      tpu.vector_store %arg13[%27, %c0_11], %26 {strides = array<i32>} : memref<32x32xf32, #tpu.memory_space<vmem>>, vector<8x32xf32>,
      %cst_12 = arith.constant 0.000000e+00 : f32
      %29 = vector.broadcast %cst_12 : f32 to vector<8x128xf32>
      %c0_13 = arith.constant 0 : index
      %c0_14 = arith.constant 0 : index
      %30 = vector.load %arg11[%c0_13, %c0_14] : memref<8x128xf32, #tpu.memory_space<vmem>>, vector<8x128xf32>
      tpu.vector_store %arg11[%c0_13, %c0_14], %29 {strides = array<i32>} : memref<8x128xf32, #tpu.memory_space<vmem>>, vector<8x128xf32>,
    } else {
    }
    %c2_i32 = arith.constant 2 : i32
    %8 = arith.cmpi eq, %arg0, %c2_i32 : i32
    %9 = arith.extui %8 : i1 to i32
    %c0_i32_2 = arith.constant 0 : i32
    %10 = arith.cmpi ne, %9, %c0_i32_2 : i32
    scf.if %10 {
      %c0_i32_3 = arith.constant 0 : i32
      %11 = arith.cmpi eq, %arg1, %c0_i32_3 : i32
      %12 = arith.extui %11 : i1 to i32
      %c0_i32_4 = arith.constant 0 : i32
      %13 = arith.cmpi ne, %12, %c0_i32_4 : i32
      scf.if %13 {
        %c0_17 = arith.constant 0 : index
        %c0_18 = arith.constant 0 : index
        %40 = vector.load %arg13[%c0_17, %c0_18] : memref<32x32xf32, #tpu.memory_space<vmem>>, vector<32x32xf32>
        %c0_19 = arith.constant 0 : index
        %c0_20 = arith.constant 0 : index
        %41 = vector.load %arg7[%c0_19, %c0_20] : memref<1x32xf32, #tpu.memory_space<vmem>>, vector<1x32xf32>
        %c0_21 = arith.constant 0 : index
        %c0_22 = arith.constant 0 : index
        %42 = vector.load %arg8[%c0_21, %c0_22] : memref<1x32xf32, #tpu.memory_space<vmem>>, vector<1x32xf32>
        %cst_23 = arith.constant dense<0.000000e+00> : vector<32xf32>
        %43 = vector.multi_reduction <add>, %40, %cst_23 [0] : vector<32x32xf32> to vector<32xf32>
        %44 = vector.shape_cast %43 : vector<32xf32> to vector<1x32xf32>
        %cst_24 = arith.constant 3.125000e-02 : f32
        %45 = vector.broadcast %cst_24 : f32 to vector<1x32xf32>
        %46 = arith.mulf %44, %45 : vector<1x32xf32>
        %47 = vector.broadcast %46 : vector<1x32xf32> to vector<32x32xf32>
        %48 = arith.subf %40, %47 : vector<32x32xf32>
        %49 = arith.mulf %48, %48 : vector<32x32xf32>
        %cst_25 = arith.constant dense<0.000000e+00> : vector<32xf32>
        %50 = vector.multi_reduction <add>, %49, %cst_25 [0] : vector<32x32xf32> to vector<32xf32>
        %51 = vector.shape_cast %50 : vector<32xf32> to vector<1x32xf32>
        %cst_26 = arith.constant 3.125000e-02 : f32
        %52 = vector.broadcast %cst_26 : f32 to vector<1x32xf32>
        %53 = arith.mulf %51, %52 : vector<1x32xf32>
        %cst_27 = arith.constant 9.99999974E-6 : f32
        %54 = vector.broadcast %cst_27 : f32 to vector<1x32xf32>
        %55 = arith.addf %53, %54 : vector<1x32xf32>
        %56 = math.rsqrt %55 : vector<1x32xf32>
        %57 = arith.mulf %41, %56 : vector<1x32xf32>
        %58 = arith.mulf %46, %57 : vector<1x32xf32>
        %59 = arith.subf %42, %58 : vector<1x32xf32>
        %c0_28 = arith.constant 0 : index
        %c0_29 = arith.constant 0 : index
        %60 = vector.load %arg15[%c0_28, %c0_29] : memref<2x32xf32, #tpu.memory_space<vmem>>, vector<1x32xf32>
        tpu.vector_store %arg15[%c0_28, %c0_29], %57 {strides = array<i32>} : memref<2x32xf32, #tpu.memory_space<vmem>>, vector<1x32xf32>,
        %c1_30 = arith.constant 1 : index
        %c0_31 = arith.constant 0 : index
        %61 = vector.load %arg15[%c1_30, %c0_31] : memref<2x32xf32, #tpu.memory_space<vmem>>, vector<1x32xf32>
        tpu.vector_store %arg15[%c1_30, %c0_31], %59 {strides = array<i32>} : memref<2x32xf32, #tpu.memory_space<vmem>>, vector<1x32xf32>,
      } else {
      }
      %14 = arith.index_cast %1 : i32 to index
      %c0 = arith.constant 0 : index
      %15 = vector.load %arg13[%14, %c0] : memref<32x32xf32, #tpu.memory_space<vmem>>, vector<8x32xf32>
      %c0_5 = arith.constant 0 : index
      %c0_6 = arith.constant 0 : index
      %16 = vector.load %arg15[%c0_5, %c0_6] : memref<2x32xf32, #tpu.memory_space<vmem>>, vector<1x32xf32>
      %17 = vector.broadcast %16 : vector<1x32xf32> to vector<8x32xf32>
      %18 = arith.mulf %15, %17 : vector<8x32xf32>
      %c1 = arith.constant 1 : index
      %c0_7 = arith.constant 0 : index
      %19 = vector.load %arg15[%c1, %c0_7] : memref<2x32xf32, #tpu.memory_space<vmem>>, vector<1x32xf32>
      %20 = vector.broadcast %19 : vector<1x32xf32> to vector<8x32xf32>
      %21 = arith.addf %18, %20 : vector<8x32xf32>
      %cst = arith.constant 0.000000e+00 : f32
      %22 = vector.broadcast %cst : f32 to vector<8x32xf32>
      %23 = arith.maximumf %21, %22 : vector<8x32xf32>
      %24 = arith.truncf %23 : vector<8x32xf32> to vector<8x32xbf16>
      %c0_8 = arith.constant 0 : index
      %c0_9 = arith.constant 0 : index
      %25 = vector.load %arg9[%c0_8, %c0_9] : memref<32x128xbf16, #tpu.memory_space<vmem>>, vector<32x128xbf16>
      %cst_10 = arith.constant dense<0.000000e+00> : vector<8x128xf32>
      %26 = tpu.matmul %24, %25, %cst_10 {dimension_numbers = #tpu.dot_dimension_numbers<[1], [0], [0], [1], [0, 0, 1, 1], [], []>} : vector<8x32xbf16>, vector<32x128xbf16>, vector<8x128xf32> -> vector<8x128xf32>
      %c0_11 = arith.constant 0 : index
      %c0_12 = arith.constant 0 : index
      %27 = vector.load %arg10[%c0_11, %c0_12] : memref<1x128xf32, #tpu.memory_space<vmem>>, vector<1x128xf32>
      %28 = vector.broadcast %27 : vector<1x128xf32> to vector<8x128xf32>
      %29 = arith.addf %26, %28 : vector<8x128xf32>
      %cst_13 = arith.constant dense<0xFF800000> : vector<8xf32>
      %30 = vector.multi_reduction <maximumf>, %29, %cst_13 [1] : vector<8x128xf32> to vector<8xf32>
      %31 = vector.shape_cast %30 : vector<8xf32> to vector<8x1xf32>
      %32 = vector.broadcast %31 : vector<8x1xf32> to vector<8x128xf32>
      %33 = arith.subf %29, %32 : vector<8x128xf32>
      %34 = math.exp %33 : vector<8x128xf32>
      %cst_14 = arith.constant dense<0.000000e+00> : vector<8xf32>
      %35 = vector.multi_reduction <add>, %34, %cst_14 [1] : vector<8x128xf32> to vector<8xf32>
      %36 = vector.shape_cast %35 : vector<8xf32> to vector<8x1xf32>
      %37 = vector.broadcast %36 : vector<8x1xf32> to vector<8x128xf32>
      %38 = arith.divf %34, %37 : vector<8x128xf32>
      %c0_15 = arith.constant 0 : index
      %c0_16 = arith.constant 0 : index
      %39 = vector.load %arg11[%c0_15, %c0_16] : memref<8x128xf32, #tpu.memory_space<vmem>>, vector<8x128xf32>
      tpu.vector_store %arg11[%c0_15, %c0_16], %38 {strides = array<i32>} : memref<8x128xf32, #tpu.memory_space<vmem>>, vector<8x128xf32>,
    } else {
    }
    return
  }
  func.func @transform_0(%arg0: i32, %arg1: i32) -> (i32, i32) {
    %c0_i32 = arith.constant 0 : i32
    %c0_i32_0 = arith.constant 0 : i32
    return %arg1, %c0_i32 : i32, i32
  }
  func.func @transform_1(%arg0: i32, %arg1: i32) -> (i32, i32) {
    %c0_i32 = arith.constant 0 : i32
    %c0_i32_0 = arith.constant 0 : i32
    %c0_i32_1 = arith.constant 0 : i32
    return %c0_i32, %c0_i32_0 : i32, i32
  }
  func.func @transform_2(%arg0: i32, %arg1: i32) -> (i32, i32) {
    %c0_i32 = arith.constant 0 : i32
    %c0_i32_0 = arith.constant 0 : i32
    %c0_i32_1 = arith.constant 0 : i32
    return %c0_i32, %c0_i32_0 : i32, i32
  }
  func.func @transform_3(%arg0: i32, %arg1: i32) -> (i32, i32) {
    %c0_i32 = arith.constant 0 : i32
    %c0_i32_0 = arith.constant 0 : i32
    %c0_i32_1 = arith.constant 0 : i32
    return %c0_i32, %c0_i32_0 : i32, i32
  }
  func.func @transform_4(%arg0: i32, %arg1: i32) -> (i32, i32) {
    %c0_i32 = arith.constant 0 : i32
    %c0_i32_0 = arith.constant 0 : i32
    %c0_i32_1 = arith.constant 0 : i32
    return %c0_i32, %c0_i32_0 : i32, i32
  }
  func.func @transform_5(%arg0: i32, %arg1: i32) -> (i32, i32) {
    %c0_i32 = arith.constant 0 : i32
    %c0_i32_0 = arith.constant 0 : i32
    %c0_i32_1 = arith.constant 0 : i32
    return %c0_i32, %c0_i32_0 : i32, i32
  }
  func.func @transform_6(%arg0: i32, %arg1: i32) -> (i32, i32) {
    %c0_i32 = arith.constant 0 : i32
    %c0_i32_0 = arith.constant 0 : i32
    %c0_i32_1 = arith.constant 0 : i32
    return %c0_i32, %c0_i32_0 : i32, i32
  }
  func.func @transform_7(%arg0: i32, %arg1: i32) -> (i32, i32) {
    %c0_i32 = arith.constant 0 : i32
    %c0_i32_0 = arith.constant 0 : i32
    %c0_i32_1 = arith.constant 0 : i32
    return %c0_i32, %c0_i32_0 : i32, i32
  }
  func.func @transform_8(%arg0: i32, %arg1: i32) -> (i32, i32) {
    %c0_i32 = arith.constant 0 : i32
    %c0_i32_0 = arith.constant 0 : i32
    %c0_i32_1 = arith.constant 0 : i32
    return %c0_i32, %c0_i32_0 : i32, i32
  }
  func.func @transform_9(%arg0: i32, %arg1: i32) -> (i32, i32) {
    %c0_i32 = arith.constant 0 : i32
    %c0_i32_0 = arith.constant 0 : i32
    return %arg1, %c0_i32 : i32, i32
  }
}

</mosaic_0001>

<bundles_post_ra>
// kernel: tpu_custom_call.1
= control target key start
LH: loop header
LB: loop body
LE: loop exit
PB: predicated region body
PF: predicated region fallthrough
CT: control target
= control target key end

     0   :  { %s1314_s0 = inlined_call_operand.vmem [shape: f32[32,32], index: 0, kind: input, shape index: {}]   ;;  %s1315_s1 = inlined_call_operand.vmem [shape: bf16[32,64], index: 1, kind: input, shape index: {}]   ;;  %s1316_s2 = inlined_call_operand.vmem [shape: f32[1,64], index: 2, kind: input, shape index: {}]   ;;  %s1317_s3 = inlined_call_operand.vmem [shape: f32[1,64], index: 3, kind: input, shape index: {}]   ;;  %s1318_s4 = inlined_call_operand.vmem [shape: bf16[64,32], index: 4, kind: input, shape index: {}]   ;;  %s1319_s5 = inlined_call_operand.vmem [shape: f32[1,32], index: 5, kind: input, shape index: {}]   ;;  %s1320_s6 = inlined_call_operand.vmem [shape: f32[1,32], index: 6, kind: input, shape index: {}]   ;;  %s1321_s7 = inlined_call_operand.hbm [shape: bf16[32,128], index: 7, kind: input, shape index: {}]   ;;  %s1322_s8 = inlined_call_operand.vmem [shape: f32[1,128], index: 8, kind: input, shape index: {}]   ;;  %s1323_s9 = inlined_call_operand.hbm [shape: f32[32,128], index: 9, kind: output, shape index: {}]  }
   0x1   :  { %1327 = sst [smem:[#allocation15_spill]] %s1321_s7 }
   0x2   :  { %14 = vsyncpa [#allocation7], 0 }
   0x3   :  { %15 = vsyncpa [#allocation8], 0 }
   0x4   :  { %17 = vsyncpa [#allocation8 + $0x1], 0  ;;  %s1123_s30 = smov 0   ;;  %s1125_s10 = smov 0  }
   0x5   :  { %s1127_s11 = smov 0   ;;  %s1129_s12 = smov 0  }
   0x6   :  { %s1131_s13 = smov 0   ;;  %s1133_s14 = smov 0  }
   0x7   :  { %s1135_s15 = smov 0   ;;  %s1137_s16 = smov 0  }
   0x8 LB: > { %1328 = sst [smem:[#allocation12_spill]] %s1062_s15  ;;  %s777_s17 = sadd.s32 4294967295, %s1066_s16   ;;  %s1066_s16 = sphi %s1137_s16, %s23_s16   ;;  %s1062_s15 = sphi %s1135_s15, %s1337_s15   ;;  %s1058_s14 = sphi %s1133_s14, %s1342_s14   ;;  %s1054_s13 = sphi %s1131_s13, %s1335_s13   ;;  %s1050_s12 = sphi %s1129_s12, %s1341_s12   ;;  %s1046_s11 = sphi %s1127_s11, %s1340_s11   ;;  %s1042_s10 = sphi %s1125_s10, %s1339_s10   ;;  %s1038_s30 = sphi %s1123_s30, %s1338_s30  }
   0x9   : > { %s778_s18 = sadd.s32 4294967294, %s1066_s16   ;;  %s32_s19 = sadd.s32 1, %s1058_s14 }
   0xa   : > { %s35_s20 = sadd.s32 1, %s1062_s15  ;;  %p33_p0 = scmp.ge.s32.totalorder %s32_s19, 4 }
   0xb   : > { %s236_s21 = sadd.s32 1, %s1046_s11  ;;  %p246_p1 = scmp.ne.s32.totalorder %s1046_s11, %s1042_s10 }
   0xc   : > { %p247_p2 = scmp.eq.s32.totalorder %s777_s17, 11  ;;  %s1344_s19 = smov (%p33_p0, %s32_s19), 0 }
   0xd   : > { %1329 = sst [smem:[#allocation13_spill]] %s1344_s19  ;;  %s1346_s20 = smov (!%p33_p0, %s35_s20), %s1062_s15 }
   0xe   : > { %s233_s22 = ssub.s32 %s1058_s14, %s1344_s19  ;;  %p1175_p3 = por %p247_p2, %p246_p1 }
   0xf   : > { %p37_p4 = scmp.ge.s32.totalorder %s1346_s20, 3  ;;  %p234_p5 = scmp.eq.s32.totalorder %s233_s22, 0 }
  0x10   : > { %p252_p6 = scmp.ne.s32.totalorder %s1042_s10, %s1038_s30  ;;  %p253_p7 = scmp.eq.s32.totalorder %s778_s18, 11 }
  0x11   : > { %s1348_s20 = smov (%p37_p4, %s1346_s20), 0  ;;  %p779_p9 = scmp.ge.s32.totalorder %s1066_s16, 1 }
  0x12   : > { %1331 = sst [smem:[#allocation14_spill]] %s1348_s20  ;;  %p1186_p8 = por %p253_p7, %p252_p6 }
  0x13   : > { %s1184_s24 = scalar_select %p234_p5, %s1046_s11, %s236_s21  }
  0x14   : > { %p260_p10 = scmp.lt.s32.totalorder %s1066_s16, 13  ;;  %s1333_s7 = sld [smem:[#allocation15_spill]] }
  0x15   : > { %p853_p12 = scmp.eq.s32.totalorder %s777_s17, 0  ;;  %s1068_s29 = smov [#allocation6]  }
  0x16   : > { %p261_p11 = pnand %p779_p9, %p260_p10  ;;  %s291_s18 = sshll.u32 %s1068_s29, 4  ;;  %s292_s18 = int_to_ptr.vmem [resolvable:$true] %s291_s18 }
  0x17   : > { %s1069_s21 = smov 64   ;;  %s1070_s22 = smov 4  }
  0x18   : > { %p845_p13 = pneg %p261_p11  ;;  %317 = sbr.rel (%p261_p11) target bundleno = 922 (0x39a), region = 56 }
  0x1a   : > { %s289_s28 = sshll.u32 %s1333_s7, 4  ;;  %p846_p0 = pnand %p853_p12, %p845_p13  ;;  %s290_s28 = int_to_ptr.hbm [resolvable:$true] %s289_s28 }
  0x1c   : > { %848 = dma.hbm_to_vmem [thread:$0]  (!%p846_p0), %s290_s28, 256, %s292_s18, [#allocation7], %s1069_s21, %s1069_s21, %s1070_s22  }
  0x1d   : > { %1029 = dma.done.wait (%p853_p12), [#allocation7], 256  }
  0x1e   : > { %1031 = vsyncadd (%p853_p12), [#allocation7], 4294967040  ;;  %s1325_s26 = sand.u32 1, %s1042_s10   ;;  %p353_p1 = scmp.lt.s32.totalorder %s1050_s12, 3 }
  0x1f   : > { %s784_s17 = sshll.u32 %s1325_s26, 3  ;;  %s1200_s27 = sshll.u32 %s1050_s12, 3 }
  0x20   : > { %s354_s29 = scalar_select %p353_p1, %s1050_s12, 3 }
  0x21   : > { %s1206_s18 = scalar_lea.vmem [#allocation9], %s784_s17  ;;  %p787_p2 = scmp.ne.s32.totalorder %s1054_s13, 0 }
  0x22   : > { %s785_s7 = sshll.u32 %s354_s29, 3 }
  0x23   : > { %s356_s28 = scalar_lea.vmem %s1314_s0, %s785_s7  ;;  %362 = sbr.rel (%p787_p2) target bundleno = 182 (0xb6), region = 64 }
  0x24   : > { %s398_s7 = scalar_lea.vmem (!%p787_p2), [#allocation2], %s1200_s27 }
  0x28   : > { %v832_v0 = vld [vmem:[%s1315_s1 + $0x8] sm:$0xff]  ;;  %v831_v1 = vld [vmem:[%s1315_s1] sm:$0xff]  ;;  %vm381_vm0 = vcmask 261120   ;;  %v1071_v4 = vmov 0.0   ;;  %vm399_vm1 = vcmask 523264  }
  0x29   : > { %391 = vmatpush.bf16.msra.mxu0 %v832_v0  ;;  %v363_v2 = vld [vmem:[%s356_s28] sm:$0xff]  ;;  %401 = vst [vmem:[%s1206_s18] sm:$0xff] %v1071_v4 }
  0x2a   : > { %v364_v3 = vpack.c.bf16 %v363_v2, %v363_v2 }
  0x2d   : > { %392 = vmatpush.bf16.msra.mxu0 %v831_v1 }
  0x30   : > { %796 = vmatmul.msk.bf16.vlgmr.msra.gmra.mxu0 %vm381_vm0, %v364_v3 }
  0xad   : > { %v394_v5 = vpop.f32.mrf.mxu0 }
  0xae   : > { %400 = vst.msk [vmem:[%s398_s7] sm:$0xff] %vm399_vm1, %v394_v5 }
  0xb5   : > { %v396_v6 = vpop.f32.mrf.mxu0 }
  0xb6 PF: > { %p797_p4 = scmp.ne.s32.totalorder %s1054_s13, 1 }
  0xb7   : > { %p798_p5 = scmp.ne.s32.totalorder (!%p797_p4), %s1050_s12, 0 }
  0xb8   : > { %405 = sbr.rel (%p797_p4) target bundleno = 418 (0x1a2), region = 68 }
  0xbd   : > { %409 = sbr.rel (%p798_p5) target bundleno = 268 (0x10c), region = 72 }
  0xc2   : > { %v410_v7 = vld [vmem:[#allocation2] sm:$0xff]  ;;  %v411_v8 = vld [vmem:[#allocation2 + $0x8] sm:$0xff]  ;;  %v412_v9 = vld [vmem:[#allocation2 + $0x10] sm:$0xff]  ;;  %vm416_vm2 = vcmask 523264   ;;  %vm467_vm6 = vcmask 516096  }
  0xc3   : > { %v413_v10 = vld [vmem:[#allocation2 + $0x18] sm:$0xff]  ;;  %v417_v11 = vsel %vm416_vm2, %v410_v7, 0.0  ;;  %v418_v12 = vsel %vm416_vm2, %v411_v8, 0.0  ;;  %v420_v13 = vsel %vm416_vm2, %v412_v9, 0.0  ;;  %v414_v53 = vld [vmem:[%s1316_s2] sm:$0x1] }
  0xc4   : > { %v419_v14 = vadd.f32 %v418_v12, %v417_v11  ;;  %v422_v15 = vsel %vm416_vm2, %v413_v10, 0.0  ;;  %v415_v57 = vld [vmem:[%s1317_s3] sm:$0x1] }
  0xc6   : > { %v421_v16 = vadd.f32 %v420_v13, %v419_v14 }
  0xc8   : > { %v423_v17 = vadd.f32 %v422_v15, %v421_v16 }
  0xca   : > { %v424_v18 = vrot.slane %v423_v17, 4 }
  0xcc   : > { %v425_v19 = vadd.f32 %v424_v18, %v423_v17 }
  0xce   : > { %v426_v20 = vrot.slane %v425_v19, 2 }
  0xd0   : > { %v427_v21 = vadd.f32 %v426_v20, %v425_v19 }
  0xd2   : > { %v428_v22 = vrot.slane %v427_v21, 1 }
  0xd4   : > { %v429_v23 = vadd.f32 %v428_v22, %v427_v21 }
  0xd6   : > { %v430_v24 = vmul.f32 0.03125, %v429_v23 }
  0xd8   : > { %v431_v25 = vsub.f32 %v410_v7, %v430_v24  ;;  %v432_v26 = vsub.f32 %v411_v8, %v430_v24  ;;  %v433_v27 = vsub.f32 %v412_v9, %v430_v24  ;;  %v434_v28 = vsub.f32 %v413_v10, %v430_v24 }
  0xda   : > { %v435_v29 = vmul.f32 %v431_v25, %v431_v25  ;;  %v436_v30 = vmul.f32 %v432_v26, %v432_v26  ;;  %v437_v31 = vmul.f32 %v433_v27, %v433_v27  ;;  %v438_v32 = vmul.f32 %v434_v28, %v434_v28 }
  0xdc   : > { %v439_v33 = vsel %vm416_vm2, %v435_v29, 0.0  ;;  %v440_v34 = vsel %vm416_vm2, %v436_v30, 0.0  ;;  %v442_v35 = vsel %vm416_vm2, %v437_v31, 0.0  ;;  %v444_v37 = vsel %vm416_vm2, %v438_v32, 0.0 }
  0xdd   : > { %v441_v36 = vadd.f32 %v440_v34, %v439_v33 }
  0xdf   : > { %v443_v38 = vadd.f32 %v442_v35, %v441_v36 }
  0xe1   : > { %v445_v39 = vadd.f32 %v444_v37, %v443_v38 }
  0xe3   : > { %v446_v40 = vrot.slane %v445_v39, 4 }
  0xe5   : > { %v447_v41 = vadd.f32 %v446_v40, %v445_v39 }
  0xe7   : > { %v448_v42 = vrot.slane %v447_v41, 2 }
  0xe9   : > { %v449_v43 = vadd.f32 %v448_v42, %v447_v41 }
  0xeb   : > { %v450_v44 = vrot.slane %v449_v43, 1 }
  0xed   : > { %v451_v45 = vadd.f32 %v450_v44, %v449_v43 }
  0xef   : > { %v452_v46 = vmul.f32 0.03125, %v451_v45 }
  0xf1   : > { %v453_v47 = vadd.f32 1e-05, %v452_v46 }
  0xf3   : > { %925 = vrsqrt.f32 %v453_v47  ;;  %vm460_vm3 = vweird.f32 %v453_v47 }
  0xf9   : > { %v926_v48 = vpop.eup %925 }
  0xfa   : > { %v455_v49 = vmul.f32 %v926_v48, %v453_v47  ;;  %vm461_vm4 = vweird.f32 %v926_v48 }
  0xfb   : > { %vm462_vm5 = vmor %vm460_vm3, %vm461_vm4 }
  0xfc   : > { %v456_v50 = vmul.f32 %v926_v48, %v455_v49 }
  0xfe   : > { %v457_v51 = vmul.f32 0.5, %v456_v50 }
 0x100   : > { %v458_v52 = vsub.f32 1.5, %v457_v51 }
 0x102   : > { %v459_v54 = vmul.f32 %v926_v48, %v458_v52 }
 0x104   : > { %v463_v55 = vsel %vm462_vm5, %v926_v48, %v459_v54 }
 0x105   : > { %v464_v56 = vmul.f32 %v463_v55, %v414_v53 }
 0x107   : > { %468 = vst.msk [vmem:[#allocation4] sm:$0x1] %vm467_vm6, %v464_v56  ;;  %v465_v58 = vmul.f32 %v464_v56, %v430_v24 }
 0x109   : > { %v466_v59 = vsub.f32 %v415_v57, %v465_v58 }
 0x10b   : > { %469 = vst.msk [vmem:[#allocation4 + $0x1] sm:$0x1] %vm467_vm6, %v466_v59 }
 0x10c PF: > { %v836_v60 = vld [vmem:[%s1318_s4 + $0x18] sm:$0xff]  ;;  %v835_v61 = vld [vmem:[%s1318_s4 + $0x10] sm:$0xff]  ;;  %s470_s22 = scalar_lea.vmem [#allocation2], %s1200_s27  ;;  %v834_v2 = vld [vmem:[%s1318_s4 + $0x8] sm:$0xff]  ;;  %vm512_vm7 = vcmask 523264   ;;  %v1072_v7 = vmov 0.0  }
 0x10d   : > { %v471_v62 = vld [vmem:[%s470_s22] sm:$0xff]  ;;  %520 = vmatpush.bf16.msra.mxu0 %v836_v60  ;;  %532 = vst [vmem:[%s1206_s18] sm:$0xff] %v1072_v7  ;;  %vm530_vm8 = vcmask 261120   ;;  %s529_s26 = scalar_lea.vmem [#allocation3], %s1200_s27 }
 0x10e   : > { %v927_v63 = vld [vmem:[#allocation4] ss:$0 sm:$0xff] }
 0x10f   : > { %v474_v1 = vmul.f32 %v927_v63, %v471_v62  ;;  %v833_v5 = vld [vmem:[%s1318_s4] sm:$0xff] }
 0x111   : > { %521 = vmatpush.bf16.msra.mxu0 %v835_v61 }
 0x112   : > { %v928_v0 = vld [vmem:[#allocation4 + $0x1] ss:$0 sm:$0xff] }
 0x113   : > { %v477_v3 = vadd.f32 %v928_v0, %v474_v1 }
 0x115   : > { %v478_v4 = vmax.f32 %v477_v3, 0.0  ;;  %522 = vmatpush.bf16.msra.mxu0 %v834_v2 }
 0x117   : > { %v479_v6 = vpack.c.bf16 %v478_v4, %v478_v4 }
 0x119   : > { %523 = vmatpush.bf16.msra.mxu0 %v833_v5 }
 0x11c   : > { %815 = vmatmul.msk.bf16.vlgmr.msra.gmra.mxu0 %vm512_vm7, %v479_v6 }
 0x199   : > { %v525_v8 = vpop.f32.mrf.mxu0 }
 0x19a   : > { %531 = vst.msk [vmem:[%s529_s26] sm:$0xff] %vm530_vm8, %v525_v8 }
 0x1a1   : > { %v527_v9 = vpop.f32.mrf.mxu0 }
 0x1a2 PF: > { %p816_p6 = scmp.ne.s32.totalorder %s1054_s13, 2 }
 0x1a3   : > { %p817_p7 = scmp.ne.s32.totalorder (!%p816_p6), %s1050_s12, 0 }
 0x1a4   : > { %536 = sbr.rel (%p816_p6) target bundleno = 908 (0x38c), region = 76 }
 0x1a9   : > { %540 = sbr.rel (%p817_p7) target bundleno = 504 (0x1f8), region = 80 }
 0x1ae   : > { %v541_v10 = vld [vmem:[#allocation3] sm:$0xff]  ;;  %v542_v11 = vld [vmem:[#allocation3 + $0x8] sm:$0xff]  ;;  %v543_v12 = vld [vmem:[#allocation3 + $0x10] sm:$0xff]  ;;  %vm547_vm9 = vcmask 261120   ;;  %vm598_vm13 = vcmask 253952  }
 0x1af   : > { %v544_v13 = vld [vmem:[#allocation3 + $0x18] sm:$0xff]  ;;  %v548_v14 = vsel %vm547_vm9, %v541_v10, 0.0  ;;  %v549_v15 = vsel %vm547_vm9, %v542_v11, 0.0  ;;  %v551_v16 = vsel %vm547_vm9, %v543_v12, 0.0  ;;  %v545_v56 = vld [vmem:[%s1319_s5] sm:$0x1] }
 0x1b0   : > { %v550_v17 = vadd.f32 %v549_v15, %v548_v14  ;;  %v553_v18 = vsel %vm547_vm9, %v544_v13, 0.0  ;;  %v546_v60 = vld [vmem:[%s1320_s6] sm:$0x1] }
 0x1b2   : > { %v552_v19 = vadd.f32 %v551_v16, %v550_v17 }
 0x1b4   : > { %v554_v20 = vadd.f32 %v553_v18, %v552_v19 }
 0x1b6   : > { %v555_v21 = vrot.slane %v554_v20, 4 }
 0x1b8   : > { %v556_v22 = vadd.f32 %v555_v21, %v554_v20 }
 0x1ba   : > { %v557_v23 = vrot.slane %v556_v22, 2 }
 0x1bc   : > { %v558_v24 = vadd.f32 %v557_v23, %v556_v22 }
 0x1be   : > { %v559_v25 = vrot.slane %v558_v24, 1 }
 0x1c0   : > { %v560_v26 = vadd.f32 %v559_v25, %v558_v24 }
 0x1c2   : > { %v561_v27 = vmul.f32 0.03125, %v560_v26 }
 0x1c4   : > { %v562_v28 = vsub.f32 %v541_v10, %v561_v27  ;;  %v563_v29 = vsub.f32 %v542_v11, %v561_v27  ;;  %v564_v30 = vsub.f32 %v543_v12, %v561_v27  ;;  %v565_v31 = vsub.f32 %v544_v13, %v561_v27 }
 0x1c6   : > { %v566_v32 = vmul.f32 %v562_v28, %v562_v28  ;;  %v567_v33 = vmul.f32 %v563_v29, %v563_v29  ;;  %v568_v34 = vmul.f32 %v564_v30, %v564_v30  ;;  %v569_v35 = vmul.f32 %v565_v31, %v565_v31 }
 0x1c8   : > { %v570_v36 = vsel %vm547_vm9, %v566_v32, 0.0  ;;  %v571_v37 = vsel %vm547_vm9, %v567_v33, 0.0  ;;  %v573_v38 = vsel %vm547_vm9, %v568_v34, 0.0  ;;  %v575_v40 = vsel %vm547_vm9, %v569_v35, 0.0 }
 0x1c9   : > { %v572_v39 = vadd.f32 %v571_v37, %v570_v36 }
 0x1cb   : > { %v574_v41 = vadd.f32 %v573_v38, %v572_v39 }
 0x1cd   : > { %v576_v42 = vadd.f32 %v575_v40, %v574_v41 }
 0x1cf   : > { %v577_v43 = vrot.slane %v576_v42, 4 }
 0x1d1   : > { %v578_v44 = vadd.f32 %v577_v43, %v576_v42 }
 0x1d3   : > { %v579_v45 = vrot.slane %v578_v44, 2 }
 0x1d5   : > { %v580_v46 = vadd.f32 %v579_v45, %v578_v44 }
 0x1d7   : > { %v581_v47 = vrot.slane %v580_v46, 1 }
 0x1d9   : > { %v582_v48 = vadd.f32 %v581_v47, %v580_v46 }
 0x1db   : > { %v583_v49 = vmul.f32 0.03125, %v582_v48 }
 0x1dd   : > { %v584_v50 = vadd.f32 1e-05, %v583_v49 }
 0x1df   : > { %929 = vrsqrt.f32 %v584_v50  ;;  %vm591_vm10 = vweird.f32 %v584_v50 }
 0x1e5   : > { %v930_v51 = vpop.eup %929 }
 0x1e6   : > { %v586_v52 = vmul.f32 %v930_v51, %v584_v50  ;;  %vm592_vm11 = vweird.f32 %v930_v51 }
 0x1e7   : > { %vm593_vm12 = vmor %vm591_vm10, %vm592_vm11 }
 0x1e8   : > { %v587_v53 = vmul.f32 %v930_v51, %v586_v52 }
 0x1ea   : > { %v588_v54 = vmul.f32 0.5, %v587_v53 }
 0x1ec   : > { %v589_v55 = vsub.f32 1.5, %v588_v54 }
 0x1ee   : > { %v590_v57 = vmul.f32 %v930_v51, %v589_v55 }
 0x1f0   : > { %v594_v58 = vsel %vm593_vm12, %v930_v51, %v590_v57 }
 0x1f1   : > { %v595_v59 = vmul.f32 %v594_v58, %v545_v56 }
 0x1f3   : > { %599 = vst.msk [vmem:[#allocation5] sm:$0x1] %vm598_vm13, %v595_v59  ;;  %v596_v61 = vmul.f32 %v595_v59, %v561_v27 }
 0x1f5   : > { %v597_v62 = vsub.f32 %v546_v60, %v596_v61 }
 0x1f7   : > { %600 = vst.msk [vmem:[#allocation5 + $0x1] sm:$0x1] %vm598_vm13, %v597_v62 }
 0x1f8 PF: > { %v838_v63 = vld [vmem:[#allocation6 + $0x8] sm:$0xff]  ;;  %s601_s28 = scalar_lea.vmem [#allocation3], %s1200_s27  ;;  %v837_v2 = vld [vmem:[#allocation6] sm:$0xff]  ;;  %vm631_vm14 = vcmask 261120   ;;  %v933_v8 = vld [vmem:[%s1322_s8] ss:$0 sm:$0xff] }
 0x1f9   : > { %v602_v0 = vld [vmem:[%s601_s28] sm:$0xff]  ;;  %641 = vmatpush.bf16.msra.mxu0 %v838_v63 }
 0x1fa   : > { %v931_v1 = vld [vmem:[#allocation5] ss:$0 sm:$0xff] }
 0x1fb   : > { %v605_v4 = vmul.f32 %v931_v1, %v602_v0 }
 0x1fd   : > { %642 = vmatpush.bf16.msra.mxu0 %v837_v2 }
 0x1fe   : > { %v932_v3 = vld [vmem:[#allocation5 + $0x1] ss:$0 sm:$0xff] }
 0x1ff   : > { %v608_v5 = vadd.f32 %v932_v3, %v605_v4 }
 0x201   : > { %v609_v6 = vmax.f32 %v608_v5, 0.0 }
 0x203   : > { %v610_v7 = vpack.c.bf16 %v609_v6, %v609_v6 }
 0x205   : > { %826 = vmatmul.msk.bf16.vlgmr.msra.gmra.mxu0 %vm631_vm14, %v610_v7 }
 0x282   : > { %v644_v9 = vpop.f32.mrf.mxu0 }
 0x283   : > { %v645_v10 = vadd.f32 %v933_v8, %v644_v9 }
 0x285   : > { %648 = vmax.xlane.f32.xlu0 %v645_v10 }
 0x28a   : > { %v646_v11 = vpop.f32.mrf.mxu0 }
 0x2f8   : > { %v649_v12 = vpop.xlane.xlu0 %648 }
 0x2f9   : > { %v650_v13 = vsub.f32 %v645_v10, %v649_v12 }
 0x2fb   : > { %v651_v14 = vmul.f32 1.442695, %v650_v13 }
 0x2fd   : > { %934 = vpow2.f32 %v651_v14 }
 0x303   : > { %v935_v15 = vpop.eup %934 }
 0x304   : > { %653 = vadd.xlane.f32.xlu0 %v935_v15 }
 0x377   : > { %v654_v16 = vpop.xlane.xlu0 %653 }
 0x378   : > { %936 = vrcp.f32 %v654_v16  ;;  %v666_v20 = vand.u32 2147483648, %v654_v16  ;;  %v664_v22 = vand.u32 2147483647, %v654_v16  ;;  %vm660_vm0 = vweird.f32 %v654_v16 }
 0x37a   : > { %v667_v24 = vor.u32 1.1754944e-38, %v666_v20  ;;  %vm665_vm2 = vcmp.eq.f32.partialorder %v664_v22, 8.507059e+37 }
 0x37e   : > { %v937_v17 = vpop.eup %936 }
 0x37f   : > { %v656_v18 = vmul.f32 %v937_v17, %v654_v16  ;;  %vm661_vm15 = vweird.f32 %v937_v17 }
 0x380   : > { %vm662_vm1 = vmor %vm660_vm0, %vm661_vm15 }
 0x381   : > { %v657_v19 = vsub.f32 1.0, %v656_v18 }
 0x383   : > { %v658_v21 = vmul.f32 %v937_v17, %v657_v19 }
 0x385   : > { %v659_v23 = vadd.f32 %v937_v17, %v658_v21 }
 0x387   : > { %v663_v25 = vsel %vm662_vm1, %v937_v17, %v659_v23 }
 0x388   : > { %v668_v26 = vsel %vm665_vm2, %v667_v24, %v663_v25 }
 0x389   : > { %v669_v27 = vmul.f32 %v935_v15, %v668_v26 }
 0x38b   : > { %670 = vst [vmem:[%s1206_s18] sm:$0xff] %v669_v27 }
 0x38c PF: > { %s682_s19 = scalar_lea.hbm %s1323_s9, %s1200_s27  ;;  %s684_s20 = sshll.u32 %s1206_s18, 4  ;;  %s685_s20 = int_to_ptr.vmem [resolvable:$true] %s684_s20 }
 0x38d   : > { %s686_s26 = sshll.u32 %s682_s19, 4  ;;  %s1334_s12 = sand.u32 1, %s1042_s10   ;;  %s687_s26 = int_to_ptr.hbm [resolvable:$true] %s686_s26 }
 0x38e   : > { %s672_s13 = scalar_lea.sflag [#allocation8], %s1334_s12  ;;  %s982_s17 = sshra.s32 %s687_s26, 4  ;;  %s983_s17 = int_to_ptr.hbm [resolvable:$true] %s982_s17 }
 0x38f   : > { %s984_s29 = scalar_lea.hbm %s983_s17, 8  ;;  %s988_s22 = scalar_lea.hbm %s1323_s9, 32 }
 0x390   : > { %p985_p9 = scmp.ne.s32.totalorder %s983_s17, %s984_s29  ;;  %p989_p12 = scmp.lt.s32.totalorder %s983_s17, %s1323_s9 }
 0x391   : > { %p990_p13 = scmp.lt.s32.totalorder %s988_s22, %s984_s29 }
 0x392   : > { %p986_p10 = pnand %p985_p9, %p1175_p3 }
 0x393   : > { %p991_p0 = por %p990_p13, %p989_p12 }
 0x394   : > { %p987_p11 = pneg %p986_p10 }
 0x396   : > { %p992_p1 = pnand %p991_p0, %p987_p11 }
 0x398   : > { %995 = shalt.err (!%p992_p1)
}
 0x399   : > { %843 = dma.vmem_to_hbm [thread:$0]  (%p1175_p3), %s685_s20, 128, %s687_s26, %s672_s13  }
 0x39a PF: > { %p855_p2 = scmp.ge.s32.totalorder %s1066_s16, 2  ;;  %s698_s27 = sand.u32 1, %s1038_s30  }
 0x39b   : > { %s699_s18 = scalar_lea.sflag [#allocation8], %s698_s27 }
 0x39c   : > { %p850_p4 = pnand %p855_p2, %p1186_p8 }
 0x39e   : > { %p851_p5 = pneg %p850_p4 }
 0x3a0   : > { %1033 = dma.done.wait (%p851_p5), %s699_s18, 128  }
 0x3a1   : > { %1035 = vsyncadd (%p851_p5), %s699_s18, 4294967168  ;;  %s23_s16 = sadd.s32 1, %s1066_s16   ;;  %s1335_s13 = sld [smem:[#allocation12_spill]] }
 0x3a2   : > { %p20_p6 = scmp.ge.s32.totalorder %s23_s16, 14   ;;  %s1336_s23 = sld [smem:[#allocation13_spill]] }
 0x3a3   : > { %s1337_s15 = sld [smem:[#allocation14_spill]]  ;;  %s1338_s30 = smov %s1042_s10 }
 0x3a4   : > { %s1339_s10 = smov %s1046_s11  ;;  %s1340_s11 = smov %s1184_s24 }
 0x3a5   : > { %s1341_s12 = smov %s1058_s14  ;;  %22 = sbr.rel (!%p20_p6) target bundleno = 8 (0x8), region = 120 }
 0x3a8   : > { %s1342_s14 = smov %s1336_s23 }
 0x3aa   :  { %705 = vsyncpa [#allocation7], 1 }
 0x3ab   :  { %707 = vsyncpa [#allocation7 + $0x1], 1 }
 0x3ac   :  { %708 = vsyncpa [#allocation8], 1 }
 0x3ad   :  { %710 = vsyncpa [#allocation8 + $0x1], 1 }

</bundles_post_ra>
